<compile_context>
chip_gen: v7x
topology: tpu7x:2x2x1
jax: 0.10.0
libtpu: 0.0.40
codegen_flags: <defaults>
</compile_context>

<pallas_src>
import functools

import jax
import jax.numpy as jnp
from jax.experimental import pallas as pl
from jax.experimental.pallas import tpu as pltpu

IN_FEATURES = 20
HIDDEN = 256
OUT_FEATURES = 10
N_PAD = 128  # lane-dense padded output width (multiple of 128 lanes)


def mlp_kernel(x_ref, w1_ref, b1_ref, w2_ref, b2_ref, o_ref):
    # Hidden layer: (TM, 20) @ (20, 256) + (1, 256) -> ReLU  (f32 accumulation on MXU)
    h = jnp.dot(x_ref[...], w1_ref[...], preferred_element_type=jnp.float32)
    h = jnp.maximum(h + b1_ref[...], 0.0)
    # Output layer, lane-dense: (TM, 256) @ (256, 128) + (1, 128)
    o = jnp.dot(h, w2_ref[...], preferred_element_type=jnp.float32)
    o_ref[...] = (o + b2_ref[...]).astype(o_ref.dtype)


def _round_up(x, m):
    return (x + m - 1) // m * m


@functools.partial(jax.jit, static_argnames=("tm",))
def mlp_forward(x, w1, b1, w2, b2, *, tm=None):
    """out = relu(x @ w1 + b1) @ w2 + b2  with x: (B, 20) f32."""
    B = x.shape[0]

    # Batch tile: multiple of 8 sublanes, capped at 1024 rows per grid step.
    if tm is None:
        tm = min(_round_up(B, 8), 1024)
    b_pad = _round_up(B, tm)
    if b_pad != B:
        x = jnp.pad(x, ((0, b_pad - B), (0, 0)))

    # Lane-dense output: zero-pad W2/b2 to 128 output columns; sliced off below.
    w2_p = jnp.pad(w2, ((0, 0), (0, N_PAD - w2.shape[1])))
    b2_p = jnp.pad(b2, ((0, 0), (0, N_PAD - b2.shape[1])))

    grid = (b_pad // tm,)
    flops = 2 * b_pad * (IN_FEATURES * HIDDEN + HIDDEN * N_PAD)
    bytes_accessed = 4 * (x.size + b_pad * N_PAD + w1.size + b1.size
                          + w2_p.size + b2_p.size)

    out_p = pl.pallas_call(
        mlp_kernel,
        out_shape=jax.ShapeDtypeStruct((b_pad, N_PAD), jnp.float32),
        grid=grid,
        in_specs=[
            # x: tiled over the batch axis, pipelined tile-by-tile.
            pl.BlockSpec((tm, IN_FEATURES), lambda i: (i, 0)),
            # Weights/biases: constant index_map -> DMA'd once, stay resident in VMEM.
            pl.BlockSpec(w1.shape, lambda i: (0, 0)),
            pl.BlockSpec(b1.shape, lambda i: (0, 0)),
            pl.BlockSpec(w2_p.shape, lambda i: (0, 0)),
            pl.BlockSpec(b2_p.shape, lambda i: (0, 0)),
        ],
        out_specs=pl.BlockSpec((tm, N_PAD), lambda i: (i, 0)),
        compiler_params=pltpu.CompilerParams(
            dimension_semantics=("parallel",),  # batch tiles shard across v7x's 2 TCs
        ),
        cost_estimate=pl.CostEstimate(
            flops=flops, transcendentals=0, bytes_accessed=bytes_accessed),
    )(x, w1, b1, w2_p, b2_p)

    # Slice away the batch padding rows and the zero lane-padding columns.
    return out_p[:B, :OUT_FEATURES]


def init_params(key, in_features=IN_FEATURES, hidden=HIDDEN, out_features=OUT_FEATURES):
    # Deterministic init mimicking nn.Linear's U(-1/sqrt(fan_in), 1/sqrt(fan_in)).
    k1, k2, k3, k4 = jax.random.split(key, 4)
    bound1 = 1.0 / jnp.sqrt(in_features)
    bound2 = 1.0 / jnp.sqrt(hidden)
    w1 = jax.random.uniform(k1, (in_features, hidden), jnp.float32, -bound1, bound1)
    b1 = jax.random.uniform(k2, (1, hidden), jnp.float32, -bound1, bound1)
    w2 = jax.random.uniform(k3, (hidden, out_features), jnp.float32, -bound2, bound2)
    b2 = jax.random.uniform(k4, (1, out_features), jnp.float32, -bound2, bound2)
    return w1, b1, w2, b2


if __name__ == "__main__":
    key = jax.random.PRNGKey(0)
    k_x, k_p = jax.random.split(key)

    batch, in_features = 2, IN_FEATURES
    x = jax.random.normal(k_x, (batch, in_features), jnp.float32)
    w1, b1, w2, b2 = init_params(k_p)

    out = mlp_forward(x, w1, b1, w2, b2)
    jax.block_until_ready(out)

    # Pure-JAX reference check of the fused kernel.
    ref = jnp.maximum(x @ w1 + b1, 0.0) @ w2 + b2
    assert out.shape == (batch, OUT_FEATURES)
    assert jnp.allclose(out, ref, atol=1e-5, rtol=1e-5)

    print("KERNEL_OK")
</pallas_src>

<mosaic_0001>
module attributes {stable_mosaic.version = 11 : i64} {
  func.func @mlp_kernel(%arg0: i32, %arg1: memref<8x20xf32, #tpu.memory_space<vmem>>, %arg2: memref<20x256xf32, #tpu.memory_space<vmem>>, %arg3: memref<1x256xf32, #tpu.memory_space<vmem>>, %arg4: memref<256x128xf32, #tpu.memory_space<vmem>>, %arg5: memref<1x128xf32, #tpu.memory_space<vmem>>, %arg6: memref<8x128xf32, #tpu.memory_space<vmem>>) attributes {dimension_semantics = [#tpu.dimension_semantics<parallel>], iteration_bounds = array<i64: 1>, scalar_prefetch = 0 : i64, scratch_operands = 0 : i64, tpu.core_type = #tpu.core_type<tc>, window_params = [{transform_indices = @transform_0, window_bounds = array<i64: 8, 20>}, {pipeline_mode = #tpu.pipeline_mode<synchronous>, transform_indices = @transform_1, window_bounds = array<i64: 20, 256>}, {pipeline_mode = #tpu.pipeline_mode<synchronous>, transform_indices = @transform_2, window_bounds = array<i64: 1, 256>}, {pipeline_mode = #tpu.pipeline_mode<synchronous>, transform_indices = @transform_3, window_bounds = array<i64: 256, 128>}, {pipeline_mode = #tpu.pipeline_mode<synchronous>, transform_indices = @transform_4, window_bounds = array<i64: 1, 128>}, {transform_indices = @transform_5, window_bounds = array<i64: 8, 128>}]} {
    %c0 = arith.constant 0 : index
    %c0_0 = arith.constant 0 : index
    %0 = vector.load %arg1[%c0, %c0_0] : memref<8x20xf32, #tpu.memory_space<vmem>>, vector<8x20xf32>
    %c0_1 = arith.constant 0 : index
    %c0_2 = arith.constant 0 : index
    %1 = vector.load %arg2[%c0_1, %c0_2] : memref<20x256xf32, #tpu.memory_space<vmem>>, vector<20x256xf32>
    %cst = arith.constant dense<0.000000e+00> : vector<8x256xf32>
    %2 = tpu.matmul %0, %1, %cst {dimension_numbers = #tpu.dot_dimension_numbers<[1], [0], [0], [1], [0, 0, 1, 1], [], []>} : vector<8x20xf32>, vector<20x256xf32>, vector<8x256xf32> -> vector<8x256xf32>
    %c0_3 = arith.constant 0 : index
    %c0_4 = arith.constant 0 : index
    %3 = vector.load %arg3[%c0_3, %c0_4] : memref<1x256xf32, #tpu.memory_space<vmem>>, vector<1x256xf32>
    %4 = vector.broadcast %3 : vector<1x256xf32> to vector<8x256xf32>
    %5 = arith.addf %2, %4 : vector<8x256xf32>
    %cst_5 = arith.constant 0.000000e+00 : f32
    %6 = vector.broadcast %cst_5 : f32 to vector<8x256xf32>
    %7 = arith.maximumf %5, %6 : vector<8x256xf32>
    %c0_6 = arith.constant 0 : index
    %c0_7 = arith.constant 0 : index
    %8 = vector.load %arg4[%c0_6, %c0_7] : memref<256x128xf32, #tpu.memory_space<vmem>>, vector<256x128xf32>
    %cst_8 = arith.constant dense<0.000000e+00> : vector<8x128xf32>
    %9 = tpu.matmul %7, %8, %cst_8 {dimension_numbers = #tpu.dot_dimension_numbers<[1], [0], [0], [1], [0, 0, 1, 1], [], []>} : vector<8x256xf32>, vector<256x128xf32>, vector<8x128xf32> -> vector<8x128xf32>
    %c0_9 = arith.constant 0 : index
    %c0_10 = arith.constant 0 : index
    %10 = vector.load %arg5[%c0_9, %c0_10] : memref<1x128xf32, #tpu.memory_space<vmem>>, vector<1x128xf32>
    %11 = vector.broadcast %10 : vector<1x128xf32> to vector<8x128xf32>
    %12 = arith.addf %9, %11 : vector<8x128xf32>
    %c0_11 = arith.constant 0 : index
    %c0_12 = arith.constant 0 : index
    %13 = vector.load %arg6[%c0_11, %c0_12] : memref<8x128xf32, #tpu.memory_space<vmem>>, vector<8x128xf32>
    tpu.vector_store %arg6[%c0_11, %c0_12], %12 {strides = array<i32>} : memref<8x128xf32, #tpu.memory_space<vmem>>, vector<8x128xf32>,
    return
  }
  func.func @transform_0(%arg0: i32) -> (i32, i32) {
    %c0_i32 = arith.constant 0 : i32
    %c0_i32_0 = arith.constant 0 : i32
    return %arg0, %c0_i32 : i32, i32
  }
  func.func @transform_1(%arg0: i32) -> (i32, i32) {
    %c0_i32 = arith.constant 0 : i32
    %c0_i32_0 = arith.constant 0 : i32
    %c0_i32_1 = arith.constant 0 : i32
    return %c0_i32, %c0_i32_0 : i32, i32
  }
  func.func @transform_2(%arg0: i32) -> (i32, i32) {
    %c0_i32 = arith.constant 0 : i32
    %c0_i32_0 = arith.constant 0 : i32
    %c0_i32_1 = arith.constant 0 : i32
    return %c0_i32, %c0_i32_0 : i32, i32
  }
  func.func @transform_3(%arg0: i32) -> (i32, i32) {
    %c0_i32 = arith.constant 0 : i32
    %c0_i32_0 = arith.constant 0 : i32
    %c0_i32_1 = arith.constant 0 : i32
    return %c0_i32, %c0_i32_0 : i32, i32
  }
  func.func @transform_4(%arg0: i32) -> (i32, i32) {
    %c0_i32 = arith.constant 0 : i32
    %c0_i32_0 = arith.constant 0 : i32
    %c0_i32_1 = arith.constant 0 : i32
    return %c0_i32, %c0_i32_0 : i32, i32
  }
  func.func @transform_5(%arg0: i32) -> (i32, i32) {
    %c0_i32 = arith.constant 0 : i32
    %c0_i32_0 = arith.constant 0 : i32
    return %arg0, %c0_i32 : i32, i32
  }
}

</mosaic_0001>

<bundles_post_ra>
// kernel: mlp_forward.1
= control target key start
LH: loop header
LB: loop body
LE: loop exit
PB: predicated region body
PF: predicated region fallthrough
CT: control target
= control target key end

     0   :  { %v313_v3 = vmov 0.0   ;;  %vm43_vm0 = vcmask 1043456   ;;  %vm39_vm1 = vcmask 162816   ;;  %v29_v58 = vlaneseq  ;;  %s472_s1 = inlined_call_operand.vmem [shape: f32[20,256], index: 1, kind: input, shape index: {}]   ;;  %s473_s3 = inlined_call_operand.vmem [shape: f32[256,128], index: 3, kind: input, shape index: {}]   ;;  %s474_s0 = inlined_call_operand.vmem [shape: f32[8,20], index: 0, kind: input, shape index: {}]   ;;  %s475_s2 = inlined_call_operand.vmem [shape: f32[1,256], index: 2, kind: input, shape index: {}]   ;;  %s476_s4 = inlined_call_operand.vmem [shape: f32[1,128], index: 4, kind: input, shape index: {}]   ;;  %s477_s5 = inlined_call_operand.vmem [shape: f32[8,128], index: 5, kind: output, shape index: {}]  }
   0x1   :  { %v22_v0 = vld [vmem:[%s472_s1 + $0x8] sm:$0xff]  ;;  %v24_v1 = vld [vmem:[%s472_s1 + $0x18] sm:$0xff]  ;;  %v21_v2 = vld [vmem:[%s472_s1] sm:$0xff]  ;;  %114 = vmatprep.mubr.f32.mxu0 %v313_v3 }
   0x2   :  { %v276_v4 = vpack.c.bf16 %v24_v1, %v22_v0  ;;  %v23_v5 = vld [vmem:[%s472_s1 + $0x10] sm:$0xff]  ;;  %v26_v7 = vld [vmem:[%s472_s1 + $0x28] sm:$0xf]  ;;  %v139_v8 = vld [vmem:[%s473_s3 + $0x80] sm:$0xff]  ;;  %v30_v59 = vshrl.u32 %v29_v58, 7 }
   0x3   :  { %v278_v6 = vpack.c.bf16 %v23_v5, %v21_v2  ;;  %v140_v9 = vld [vmem:[%s473_s3 + $0x88] sm:$0xff]  ;;  %v123_v11 = vld [vmem:[%s473_s3] sm:$0xff]  ;;  %v141_v13 = vld [vmem:[%s473_s3 + $0x90] sm:$0xff] }
   0x4   :  { %277 = vmatprep.subr.bf16.mxu0 %v276_v4  ;;  %v280_v10 = vpack.c.bf16 %v140_v9, %v139_v8  ;;  %v124_v12 = vld [vmem:[%s473_s3 + $0x8] sm:$0xff]  ;;  %v142_v15 = vld [vmem:[%s473_s3 + $0x98] sm:$0xff]  ;;  %v125_v16 = vld [vmem:[%s473_s3 + $0x10] sm:$0xff]  ;;  %v31_v60 = vsub.s32 0, %v30_v59  ;;  %v35_v62 = vsub.s32 1, %v30_v59 }
   0x5   :  { %279 = vmatpush1.bf16.msra.mxu0 %v278_v6  ;;  %v282_v14 = vpack.c.bf16 %v124_v12, %v123_v11  ;;  %v126_v17 = vld [vmem:[%s473_s3 + $0x18] sm:$0xff]  ;;  %v25_v18 = vld [vmem:[%s472_s1 + $0x20] sm:$0xf]  ;;  %v284_v19 = vpack.c.bf16 %v142_v15, %v141_v13  ;;  %v144_v21 = vld [vmem:[%s473_s3 + $0xa8] sm:$0xff] }
   0x6   :  { %237 = vmatprep.subr.msk.mxu0 %vm43_vm0, %v26_v7  ;;  %281 = vmatprep.subr.bf16.mxu1 %v280_v10  ;;  %v143_v20 = vld [vmem:[%s473_s3 + $0xa0] sm:$0xff]  ;;  %v286_v23 = vpack.c.bf16 %v126_v17, %v125_v16  ;;  %v128_v26 = vld [vmem:[%s473_s3 + $0x28] sm:$0xff]  ;;  %v145_v27 = vld [vmem:[%s473_s3 + $0xb0] sm:$0xff] }
   0x7   :  { %v20_v22 = vld [vmem:[%s474_s0] sm:$0xff]  ;;  %283 = vmatpush3.bf16.msra.mxu1 %v282_v14  ;;  %v288_v24 = vpack.c.bf16 %v144_v21, %v143_v20  ;;  %v146_v28 = vld [vmem:[%s473_s3 + $0xb8] sm:$0xff]  ;;  %v129_v31 = vld [vmem:[%s473_s3 + $0x30] sm:$0xff] }
   0x8   :  { %285 = vmatprep.subr.bf16.mxu1 %v284_v19  ;;  %v127_v25 = vld [vmem:[%s473_s3 + $0x20] sm:$0xff]  ;;  %v292_v30 = vpack.c.bf16 %v146_v28, %v145_v27  ;;  %v130_v32 = vld [vmem:[%s473_s3 + $0x38] sm:$0xff]  ;;  %v148_v34 = vld [vmem:[%s473_s3 + $0xc8] sm:$0xff] }
   0x9   :  { %238 = vmatpush1.msk.msra.mxu0 %vm43_vm0, %v25_v18  ;;  %v290_v29 = vpack.c.bf16 %v128_v26, %v127_v25  ;;  %v147_v33 = vld [vmem:[%s473_s3 + $0xc0] sm:$0xff]  ;;  %v294_v35 = vpack.c.bf16 %v130_v32, %v129_v31  ;;  %v132_v38 = vld [vmem:[%s473_s3 + $0x48] sm:$0xff]  ;;  %v149_v39 = vld [vmem:[%s473_s3 + $0xd0] sm:$0xff] }
   0xa   :  { %239 = vmatmul.mubr.msk.f32.vlgmr.msra.gmra.mrb[0].mxu0 %vm39_vm1, %v20_v22  ;;  %v296_v36 = vpack.c.bf16 %v148_v34, %v147_v33  ;;  %v131_v37 = vld [vmem:[%s473_s3 + $0x40] sm:$0xff]  ;;  %v150_v40 = vld [vmem:[%s473_s3 + $0xd8] sm:$0xff]  ;;  %v133_v43 = vld [vmem:[%s473_s3 + $0x50] sm:$0xff] }
   0xb   :  { %287 = vmatpush3.bf16.msra.mxu1 %v286_v23  ;;  %v298_v41 = vpack.c.bf16 %v132_v38, %v131_v37  ;;  %v300_v42 = vpack.c.bf16 %v150_v40, %v149_v39  ;;  %v134_v44 = vld [vmem:[%s473_s3 + $0x58] sm:$0xff]  ;;  %v151_v45 = vld [vmem:[%s473_s3 + $0xe0] sm:$0xff]  ;;  %v152_v46 = vld [vmem:[%s473_s3 + $0xe8] sm:$0xff] }
   0xc   :  { %289 = vmatprep.subr.bf16.mxu1 %v288_v24  ;;  %v302_v47 = vpack.c.bf16 %v134_v44, %v133_v43  ;;  %v304_v48 = vpack.c.bf16 %v152_v46, %v151_v45  ;;  %v135_v49 = vld [vmem:[%s473_s3 + $0x60] sm:$0xff]  ;;  %v136_v50 = vld [vmem:[%s473_s3 + $0x68] sm:$0xff]  ;;  %v153_v52 = vld [vmem:[%s473_s3 + $0xf0] sm:$0xff] }
   0xd   :  { %v306_v51 = vpack.c.bf16 %v136_v50, %v135_v49  ;;  %v154_v53 = vld [vmem:[%s473_s3 + $0xf8] sm:$0xff]  ;;  %v137_v55 = vld [vmem:[%s473_s3 + $0x70] sm:$0xff]  ;;  %v27_v61 = vld [vmem:[%s475_s2] sm:$0x3] }
   0xe   :  { %v308_v54 = vpack.c.bf16 %v154_v53, %v153_v52  ;;  %v138_v56 = vld [vmem:[%s473_s3 + $0x78] sm:$0xff]  ;;  %v32_v63 = vrot.slane %v27_v61, %v31_v60  ;;  %v36_v0 = vrot.slane %v27_v61, %v35_v62  ;;  %v240_v8 = vld [vmem:[%s476_s4] ss:$0 sm:$0xff] }
   0xf   :  { %291 = vmatpush3.bf16.msra.mxu1 %v290_v29  ;;  %v310_v57 = vpack.c.bf16 %v138_v56, %v137_v55 }
  0x10   :  { %293 = vmatprep.subr.bf16.mxu1 %v292_v30 }
  0x13   :  { %295 = vmatpush3.bf16.msra.mxu1 %v294_v35 }
  0x14   :  { %297 = vmatprep.subr.bf16.mxu1 %v296_v36 }
  0x17   :  { %299 = vmatpush3.bf16.msra.mxu1 %v298_v41 }
  0x18   :  { %301 = vmatprep.subr.bf16.mxu1 %v300_v42 }
  0x1b   :  { %303 = vmatpush3.bf16.msra.mxu1 %v302_v47 }
  0x1c   :  { %305 = vmatprep.subr.bf16.mxu1 %v304_v48 }
  0x1f   :  { %307 = vmatpush3.bf16.msra.mxu1 %v306_v51 }
  0x20   :  { %309 = vmatprep.subr.bf16.mxu1 %v308_v54 }
  0x23   :  { %311 = vmatpush3.bf16.msra.mxu1 %v310_v57 }
  0xdd   :  { %v116_v1 = vpop.f32.mrb[0].mxu0 }
  0xde   :  { %v117_v2 = vadd.f32 %v116_v1, %v32_v63  ;;  %v118_v3 = vpop.f32.mrb[1].mxu0 }
  0xdf   :  { %v119_v4 = vadd.f32 %v118_v3, %v36_v0 }
  0xe0   :  { %v121_v6 = vmax.f32 %v117_v2, 0.0 }
  0xe1   :  { %v122_v5 = vmax.f32 %v119_v4, 0.0 }
  0xe3   :  { %226 = vmatprep.mubr.f32.mxu1 %v122_v5 }
  0xe4   :  { %227 = vmatmul.mubr.f32.vlgmr.msra.gmra.mrb[0].mxu1 %v121_v6 }
 0x1b7   :  { %v273_v7 = vpop.f32.mrb[0].mxu1 }
 0x1b8   :  { %v274_v9 = vpop.f32.mrb[1].mxu1 }
 0x1b9   :  { %v275_v10 = vadd.f32 %v274_v9, %v273_v7 }
 0x1bb   :  { %v229_v11 = vadd.f32 %v275_v10, %v240_v8 }
 0x1bd   :  { %232 = vst [vmem:[%s477_s5] sm:$0xff] %v229_v11 }

</bundles_post_ra>
